<compile_context>
chip_gen: v6e
topology: v6e:2x2x1
jax: 0.10.0
libtpu: 0.0.40
codegen_flags: <defaults>
</compile_context>

<pallas_src>
import functools

import jax
import jax.numpy as jnp
from jax.experimental import pallas as pl
from jax.experimental.pallas import tpu as pltpu


@functools.lru_cache(maxsize=8)
def _dft_matrices(seq: int, hidden: int):
    """bf16 DFT matrices: C_h, S_h (hidden) and fused [C_s | -S_s] (seq).

    DFT convention exp(-2*pi*i*j*k/N) = C - i*S (matches fftn / scipy dft).
    The j*k product is reduced mod N in integer arithmetic so the angle stays
    in [0, 2*pi) and cos/sin remain accurate before the bf16 round.
    """
    def cos_sin(n):
        idx = jnp.arange(n, dtype=jnp.int32)
        prod = (idx[:, None] * idx[None, :]) % n
        theta = (2.0 * jnp.pi / n) * prod.astype(jnp.float32)
        return jnp.cos(theta), jnp.sin(theta)

    ch, sh = cos_sin(hidden)                       # (H, H)
    cs, ss = cos_sin(seq)                          # (S, S)
    csn = jnp.concatenate([cs, -ss], axis=1)       # (S, 2S): [C_s | -S_s]
    return (ch.astype(jnp.bfloat16),
            sh.astype(jnp.bfloat16),
            csn.astype(jnp.bfloat16))


def _fnet_fourier_kernel(x_ref, ch_ref, sh_ref, csn_ref, o_ref, z_ref):
    seq = x_ref.shape[1]

    # Stage 1: hidden-dim DFT, once per batch element (first seq tile only).
    # Z rows [0, S) = xr = x @ C_h ; rows [S, 2S) = xi = x @ S_h (f32 accum).
    @pl.when(pl.program_id(1) == 0)
    def _():
        x = x_ref[0]                               # (S, H), native dtype
        z_ref[0:seq, :] = jnp.dot(x, ch_ref[...],
                                  preferred_element_type=jnp.float32)
        z_ref[seq:2 * seq, :] = jnp.dot(x, sh_ref[...],
                                        preferred_element_type=jnp.float32)

    # Stage 2 (fused): out = [C_s | -S_s] @ [xr ; xi], real part of the 2-D DFT.
    # Operands go to the MXU in bf16; accumulation stays f32.
    z_bf16 = z_ref[...].astype(jnp.bfloat16)
    out = jnp.dot(csn_ref[...], z_bf16, preferred_element_type=jnp.float32)
    o_ref[0] = out.astype(o_ref.dtype)


def _pick_seq_tile(seq: int, hidden: int, x_bytes: int, out_bytes: int,
                   budget: int) -> int:
    """Largest output-row tile (divisor of seq, multiple of 8 or full extent)
    whose working set fits the VMEM budget."""
    fixed = (2 * seq * hidden * x_bytes            # x block, double-buffered
             + 2 * 2 * hidden * hidden * 2         # C_h, S_h bf16, double-buffered
             + 2 * seq * hidden * 4)               # Z scratch (f32)
    candidates = [t for t in (seq, 4096, 2048, 1024, 512, 256, 128, 64, 32, 16, 8)
                  if t <= seq and seq % t == 0]
    for t in candidates:
        per_tile = (2 * t * 2 * seq * 2            # [C_s|-S_s] tile (bf16), db
                    + 2 * t * hidden * out_bytes)  # output tile, db
        if fixed + per_tile <= budget:
            return t
    return candidates[-1]


def fnet_basic_fourier_transform(hidden_states):
    """Real part of the 2-D DFT over (seq, hidden) of a real (B, S, H) tensor."""
    B, S, H = hidden_states.shape
    ch, sh, csn = _dft_matrices(S, H)

    x_bytes = jnp.dtype(hidden_states.dtype).itemsize
    out_bytes = x_bytes

    # Generation-aware VMEM budget (v5e/v6e: 128 MiB, v7x: 64 MiB per core).
    try:
        vmem_cap = int(pltpu.get_tpu_info().vmem_capacity_bytes)
    except Exception:
        vmem_cap = 64 << 20                        # conservative fallback
    budget = max(min(vmem_cap - (8 << 20), 112 << 20), 32 << 20)

    tile_s = _pick_seq_tile(S, H, x_bytes, out_bytes, budget)
    n_seq_tiles = S // tile_s

    fixed = (2 * S * H * x_bytes
             + 2 * 2 * H * H * 2
             + 2 * S * H * 4)
    per_tile = (2 * tile_s * 2 * S * 2
                + 2 * tile_s * H * out_bytes)
    vmem_limit = int(min(max(fixed + per_tile + (8 << 20), 16 << 20), budget))

    out = pl.pallas_call(
        _fnet_fourier_kernel,
        out_shape=jax.ShapeDtypeStruct((B, S, H), hidden_states.dtype),
        grid_spec=pltpu.PrefetchScalarGridSpec(
            num_scalar_prefetch=0,
            grid=(B, n_seq_tiles),
            in_specs=[
                pl.BlockSpec((1, S, H), lambda b, j: (b, 0, 0)),       # x
                pl.BlockSpec((H, H), lambda b, j: (0, 0)),             # C_h (bf16)
                pl.BlockSpec((H, H), lambda b, j: (0, 0)),             # S_h (bf16)
                pl.BlockSpec((tile_s, 2 * S), lambda b, j: (j, 0)),    # [C_s|-S_s] rows
            ],
            out_specs=pl.BlockSpec((1, tile_s, H), lambda b, j: (b, j, 0)),
            scratch_shapes=[
                pltpu.VMEM((2 * S, H), jnp.float32),   # Z = [xr ; xi]
            ],
        ),
        compiler_params=pltpu.CompilerParams(
            dimension_semantics=("parallel", "arbitrary"),
            vmem_limit_bytes=vmem_limit,
        ),
    )(hidden_states, ch, sh, csn)

    return out  # PyTorch module wraps this as a 1-tuple: (out,)


def _reference(hidden_states):
    return jnp.fft.fftn(hidden_states.astype(jnp.complex64), axes=(1, 2)).real.astype(
        hidden_states.dtype
    )


if __name__ == "__main__":
    batch, seq, hidden = 2, 8, 32

    key = jax.random.PRNGKey(0)
    hidden_states = jax.random.normal(key, (batch, seq, hidden), dtype=jnp.float32)

    out = fnet_basic_fourier_transform(hidden_states)
    out = jax.block_until_ready(out)

    ref = _reference(hidden_states)
    assert out.shape == (batch, seq, hidden)

    # bf16 DFT matrices + bf16 MXU operands: compare at bf16-level tolerance,
    # scaled to the magnitude of the DFT coefficients.
    err = float(jnp.max(jnp.abs(out - ref)))
    scale = float(jnp.max(jnp.abs(ref)))
    assert err <= 3e-2 * scale + 3e-2, f"mismatch vs FFT reference: err={err}, scale={scale}"

    print("KERNEL_OK")
</pallas_src>

<mosaic_0001>
module attributes {stable_mosaic.version = 11 : i64} {
  func.func @_fnet_fourier_kernel(%arg0: i32, %arg1: i32, %arg2: memref<1x8x32xf32, #tpu.memory_space<vmem>>, %arg3: memref<32x32xbf16, #tpu.memory_space<vmem>>, %arg4: memref<32x32xbf16, #tpu.memory_space<vmem>>, %arg5: memref<8x16xbf16, #tpu.memory_space<vmem>>, %arg6: memref<1x8x32xf32, #tpu.memory_space<vmem>>, %arg7: memref<16x32xf32, #tpu.memory_space<vmem>>) attributes {dimension_semantics = [#tpu.dimension_semantics<parallel>, #tpu.dimension_semantics<arbitrary>], iteration_bounds = array<i64: 2, 1>, scalar_prefetch = 0 : i64, scratch_operands = 1 : i64, tpu.core_type = #tpu.core_type<tc>, window_params = [{transform_indices = @transform_0, window_bounds = array<i64: 1, 8, 32>}, {pipeline_mode = #tpu.pipeline_mode<synchronous>, transform_indices = @transform_1, window_bounds = array<i64: 32, 32>}, {pipeline_mode = #tpu.pipeline_mode<synchronous>, transform_indices = @transform_2, window_bounds = array<i64: 32, 32>}, {transform_indices = @transform_3, window_bounds = array<i64: 8, 16>}, {transform_indices = @transform_4, window_bounds = array<i64: 1, 8, 32>}]} {
    %c0_i32 = arith.constant 0 : i32
    %0 = arith.cmpi eq, %arg1, %c0_i32 : i32
    %1 = arith.extui %0 : i1 to i32
    %c0_i32_0 = arith.constant 0 : i32
    %2 = arith.cmpi ne, %1, %c0_i32_0 : i32
    scf.if %2 {
      %c0_7 = arith.constant 0 : index
      %c0_8 = arith.constant 0 : index
      %c0_9 = arith.constant 0 : index
      %10 = vector.load %arg2[%c0_7, %c0_8, %c0_9] : memref<1x8x32xf32, #tpu.memory_space<vmem>>, vector<1x8x32xf32>
      %11 = vector.shape_cast %10 : vector<1x8x32xf32> to vector<8x32xf32>
      %c0_10 = arith.constant 0 : index
      %c0_11 = arith.constant 0 : index
      %12 = vector.load %arg3[%c0_10, %c0_11] : memref<32x32xbf16, #tpu.memory_space<vmem>>, vector<32x32xbf16>
      %cst_12 = arith.constant dense<0.000000e+00> : vector<8x32xf32>
      %13 = tpu.matmul %11, %12, %cst_12 {dimension_numbers = #tpu.dot_dimension_numbers<[1], [0], [0], [1], [0, 0, 1, 1], [], []>} : vector<8x32xf32>, vector<32x32xbf16>, vector<8x32xf32> -> vector<8x32xf32>
      %c0_13 = arith.constant 0 : index
      %c0_14 = arith.constant 0 : index
      %14 = vector.load %arg7[%c0_13, %c0_14] : memref<16x32xf32, #tpu.memory_space<vmem>>, vector<8x32xf32>
      tpu.vector_store %arg7[%c0_13, %c0_14], %13 {strides = array<i32>} : memref<16x32xf32, #tpu.memory_space<vmem>>, vector<8x32xf32>,
      %c0_15 = arith.constant 0 : index
      %c0_16 = arith.constant 0 : index
      %15 = vector.load %arg4[%c0_15, %c0_16] : memref<32x32xbf16, #tpu.memory_space<vmem>>, vector<32x32xbf16>
      %cst_17 = arith.constant dense<0.000000e+00> : vector<8x32xf32>
      %16 = tpu.matmul %11, %15, %cst_17 {dimension_numbers = #tpu.dot_dimension_numbers<[1], [0], [0], [1], [0, 0, 1, 1], [], []>} : vector<8x32xf32>, vector<32x32xbf16>, vector<8x32xf32> -> vector<8x32xf32>
      %c8 = arith.constant 8 : index
      %c0_18 = arith.constant 0 : index
      %17 = vector.load %arg7[%c8, %c0_18] : memref<16x32xf32, #tpu.memory_space<vmem>>, vector<8x32xf32>
      tpu.vector_store %arg7[%c8, %c0_18], %16 {strides = array<i32>} : memref<16x32xf32, #tpu.memory_space<vmem>>, vector<8x32xf32>,
    } else {
    }
    %c0 = arith.constant 0 : index
    %c0_1 = arith.constant 0 : index
    %3 = vector.load %arg7[%c0, %c0_1] : memref<16x32xf32, #tpu.memory_space<vmem>>, vector<16x32xf32>
    %4 = arith.truncf %3 : vector<16x32xf32> to vector<16x32xbf16>
    %c0_2 = arith.constant 0 : index
    %c0_3 = arith.constant 0 : index
    %5 = vector.load %arg5[%c0_2, %c0_3] : memref<8x16xbf16, #tpu.memory_space<vmem>>, vector<8x16xbf16>
    %cst = arith.constant dense<0.000000e+00> : vector<8x32xf32>
    %6 = tpu.matmul %5, %4, %cst {dimension_numbers = #tpu.dot_dimension_numbers<[1], [0], [0], [1], [0, 0, 1, 1], [], []>} : vector<8x16xbf16>, vector<16x32xbf16>, vector<8x32xf32> -> vector<8x32xf32>
    %c0_4 = arith.constant 0 : index
    %c0_5 = arith.constant 0 : index
    %c0_6 = arith.constant 0 : index
    %7 = vector.load %arg6[%c0_4, %c0_5, %c0_6] : memref<1x8x32xf32, #tpu.memory_space<vmem>>, vector<1x8x32xf32>
    %8 = vector.shape_cast %7 : vector<1x8x32xf32> to vector<8x32xf32>
    %9 = vector.shape_cast %6 : vector<8x32xf32> to vector<1x8x32xf32>
    tpu.vector_store %arg6[%c0_4, %c0_5, %c0_6], %9 {strides = array<i32>} : memref<1x8x32xf32, #tpu.memory_space<vmem>>, vector<1x8x32xf32>,
    return
  }
  func.func @transform_0(%arg0: i32, %arg1: i32) -> (i32, i32, i32) {
    %c0_i32 = arith.constant 0 : i32
    %c0_i32_0 = arith.constant 0 : i32
    %c0_i32_1 = arith.constant 0 : i32
    return %arg0, %c0_i32, %c0_i32_0 : i32, i32, i32
  }
  func.func @transform_1(%arg0: i32, %arg1: i32) -> (i32, i32) {
    %c0_i32 = arith.constant 0 : i32
    %c0_i32_0 = arith.constant 0 : i32
    %c0_i32_1 = arith.constant 0 : i32
    return %c0_i32, %c0_i32_0 : i32, i32
  }
  func.func @transform_2(%arg0: i32, %arg1: i32) -> (i32, i32) {
    %c0_i32 = arith.constant 0 : i32
    %c0_i32_0 = arith.constant 0 : i32
    %c0_i32_1 = arith.constant 0 : i32
    return %c0_i32, %c0_i32_0 : i32, i32
  }
  func.func @transform_3(%arg0: i32, %arg1: i32) -> (i32, i32) {
    %c0_i32 = arith.constant 0 : i32
    %c0_i32_0 = arith.constant 0 : i32
    return %arg1, %c0_i32 : i32, i32
  }
  func.func @transform_4(%arg0: i32, %arg1: i32) -> (i32, i32, i32) {
    %c0_i32 = arith.constant 0 : i32
    %c0_i32_0 = arith.constant 0 : i32
    return %arg0, %arg1, %c0_i32 : i32, i32, i32
  }
}

</mosaic_0001>

<bundles_post_ra>
// kernel: tpu_custom_call.1
= control target key start
LH: loop header
LB: loop body
LE: loop exit
PB: predicated region body
PF: predicated region fallthrough
CT: control target
= control target key end

     0   :  { %9 = vsyncpa [#allocation4], 0  ;;  %s1115_s0 = inlined_call_operand.hbm [shape: f32[2,8,32], index: 0, kind: input, shape index: {}]   ;;  %s1116_s1 = inlined_call_operand.hbm [shape: bf16[32,32], index: 1, kind: input, shape index: {}]   ;;  %s1117_s2 = inlined_call_operand.hbm [shape: bf16[32,32], index: 2, kind: input, shape index: {}]   ;;  %s1118_s3 = inlined_call_operand.vmem [shape: bf16[8,16], index: 3, kind: input, shape index: {}]   ;;  %s1119_s4 = inlined_call_operand.hbm [shape: f32[2,8,32], index: 4, kind: output, shape index: {}]  }
   0x1   :  { %11 = vsyncpa [#allocation4 + $0x1], 0 }
   0x2   :  { %12 = vsyncpa [#allocation7], 0 }
   0x3   :  { %13 = vsyncpa [#allocation5], 0 }
   0x4   :  { %15 = vsyncpa [#allocation5 + $0x1], 0  ;;  %s914_s15 = smov 0   ;;  %s916_s16 = smov 0  }
   0x5   :  { %s918_s17 = smov 0   ;;  %s920_s18 = smov 0  }
   0x6   :  { %s922_s19 = smov 0   ;;  %s924_s20 = smov 0  }
   0x7 LB: > { %s571_s21 = sadd.s32 4294967295, %s879_s20   ;;  %s572_s22 = sadd.s32 4294967294, %s879_s20   ;;  %s879_s20 = sphi %s924_s20, %s21_s20   ;;  %s875_s19 = sphi %s922_s19, %s1139_s19   ;;  %s871_s18 = sphi %s920_s18, %s1138_s18   ;;  %s867_s17 = sphi %s918_s17, %s1137_s17   ;;  %s863_s16 = sphi %s916_s16, %s1136_s16   ;;  %s859_s15 = sphi %s914_s15, %s1135_s15  }
   0x8   : > { %p53_p0 = scmp.ne.s32.totalorder %s863_s16, %s859_s15  ;;  %p948_p1 = scmp.eq.s32.totalorder %s571_s21, 0 }
   0x9   : > { %p952_p2 = scmp.eq.s32.totalorder %s571_s21, 1  ;;  %p153_p3 = scmp.eq.s32.totalorder %s572_s22, 1 }
   0xa   : > { %s1123_s23 = scalar_select %p948_p1, 1, 0 }
   0xb   : > { %p958_p4 = por %p948_p1, %p53_p0  ;;  %p573_p5 = scmp.ge.s32.totalorder %s879_s20, 1 }
   0xc   : > { %p963_p6 = por %p153_p3, %p53_p0  ;;  %p160_p7 = scmp.lt.s32.totalorder %s879_s20, 3 }
   0xd   : > { %s1125_s25 = scalar_select %p958_p4, 1, 0 }
   0xe   : > { %s1126_s26 = scalar_select %p963_p6, 1, 0 }
   0xf   : > { %p968_p8 = pnand %p573_p5, %p160_p7  ;;  %s881_s28 = smov [#allocation6]  }
  0x10   : > { %s172_s29 = sshll.u32 %s881_s28, 4  ;;  %s882_s5 = smov [#allocation8]   ;;  %s173_s29 = int_to_ptr.vmem [resolvable:$true] %s172_s29 }
  0x11   : > { %p636_p9 = pneg %p968_p8  ;;  %s185_s6 = sshll.u32 %s882_s5, 4  ;;  %s186_s6 = int_to_ptr.vmem [resolvable:$true] %s185_s6 }
  0x12   : > { %s726_s7 = scalar_lea.vmem %s173_s29, 256  ;;  %p734_p5 = scmp.lt.s32.totalorder %s173_s29, %s173_s29 }
  0x13   : > { %p977_p11 = pnand %p636_p9, %p948_p1  ;;  %p727_p13 = scmp.ne.s32.totalorder %s173_s29, %s726_s7 }
  0x14   : > { %p735_p7 = scmp.lt.s32.totalorder %s726_s7, %s726_s7 }
  0x15   : > { %p717_p12 = pneg %p977_p11 }
  0x16   : > { %p736_p10 = por %p735_p7, %p734_p5 }
  0x17   : > { %p729_p0 = pnand %p727_p13, %p717_p12 }
  0x19   : > { %p730_p3 = pneg %p729_p0 }
  0x1b   : > { %p737_p9 = pnand %p736_p10, %p730_p3 }
  0x1d   : > { %740 = shalt.err (!%p737_p9)
}
  0x1e   : > { %s883_s8 = smov 64   ;;  %s884_s9 = smov 4  }
  0x1f   : > { %639 = dma.hbm_to_vmem [thread:$0]  (!%p977_p11), %s1116_s1, 256, %s173_s29, [#allocation7], %s883_s8, %s883_s8, %s884_s9  }
  0x20   : > { %s752_s12 = scalar_lea.vmem %s186_s6, 256  ;;  %p760_p1 = scmp.lt.s32.totalorder %s186_s6, %s186_s6 }
  0x21   : > { %p753_p6 = scmp.ne.s32.totalorder %s186_s6, %s752_s12  ;;  %p761_p4 = scmp.lt.s32.totalorder %s752_s12, %s752_s12 }
  0x23   : > { %p755_p13 = pnand %p753_p6, %p717_p12  ;;  %p762_p5 = por %p761_p4, %p760_p1 }
  0x25   : > { %p756_p0 = pneg %p755_p13 }
  0x27   : > { %p763_p10 = pnand %p762_p5, %p756_p0 }
  0x29   : > { %766 = shalt.err (!%p763_p10)
}
  0x2a   : > { %642 = dma.hbm_to_vmem [thread:$0]  (!%p977_p11), %s1117_s2, 256, %s186_s6, [#allocation7], %s883_s8, %s883_s8, %s884_s9  }
  0x2b   : > { %s33_s21 = sadd.s32 1, %s875_s19  ;;  %s40_s22 = sadd.s32 1, %s867_s17 }
  0x2c   : > { %p35_p1 = scmp.ge.s32.totalorder %s33_s21, 2  ;;  %p47_p4 = scmp.ne.s32.totalorder %s867_s17, %s863_s16 }
  0x2d   : > { %p48_p6 = scmp.eq.s32.totalorder %s879_s20, 0  ;;  %p653_p12 = scmp.lt.s32.totalorder %s879_s20, 2 }
  0x2e   : > { %s1141_s21 = smov (%p35_p1, %s33_s21), 0  ;;  %p1009_p7 = por %p952_p2, %p47_p4 }
  0x2f   : > { %p49_p3 = por %p48_p6, %p47_p4  ;;  %s37_s29 = ssub.s32 %s875_s19, %s1141_s21 }
  0x30   : > { %s206_s30 = sand.u32 1, %s867_s17   ;;  %p38_p9 = scmp.eq.s32.totalorder %s37_s29, 0 }
  0x31   : > { %s578_s5 = sshll.u32 %s206_s30, 3  ;;  %s579_s6 = sshll.u32 %s875_s19, 7 }
  0x32   : > { %s1018_s7 = scalar_select %p38_p9, %s867_s17, %s40_s22  }
  0x33   : > { %s215_s10 = scalar_lea.hbm %s1115_s0, %s579_s6  ;;  %s210_s11 = scalar_lea.vmem [#allocation3], %s578_s5 }
  0x34   : > { %s217_s12 = sshll.u32 %s210_s11, 4  ;;  %p1025_p11 = pnand %p653_p12, %p49_p3  ;;  %s218_s12 = int_to_ptr.vmem [resolvable:$true] %s217_s12 }
  0x35   : > { %s207_s13 = scalar_lea.sflag [#allocation4], %s206_s30  ;;  %s780_s14 = scalar_lea.vmem %s218_s12, 128 }
  0x36   : > { %p769_p2 = pneg %p1025_p11  ;;  %p781_p13 = scmp.ne.s32.totalorder %s218_s12, %s780_s14 }
  0x37   : > { %s885_s22 = smov [#allocation3]  }
  0x38   : > { %p783_p0 = pnand %p781_p13, %p769_p2  ;;  %s785_s29 = sshll.u32 %s885_s22, 4  ;;  %s786_s29 = int_to_ptr.vmem [resolvable:$false] %s785_s29 }
  0x39   : > { %s787_s6 = scalar_lea.vmem %s786_s29, 256  ;;  %p788_p10 = scmp.lt.s32.totalorder %s218_s12, %s786_s29 }
  0x3a   : > { %p784_p5 = pneg %p783_p0  ;;  %p789_p1 = scmp.lt.s32.totalorder %s787_s6, %s780_s14 }
  0x3c   : > { %p790_p4 = por %p789_p1, %p788_p10 }
  0x3e   : > { %p791_p6 = pnand %p790_p4, %p784_p5 }
  0x40   : > { %794 = shalt.err (!%p791_p6)
}
  0x41   : > { %646 = dma.hbm_to_vmem [thread:$0]  (!%p1025_p11), %s215_s10, 128, %s218_s12, %s207_s13  }
  0x42   : > { %226 = sbr.rel (%p968_p8) target bundleno = 500 (0x1f4), region = 36  ;;  %s1036_s30 = sand.u32 (!%p968_p8), 1, %s863_s16  }
  0x43   : > { %s581_s5 = sshll.u32 (!%p968_p8), %s1036_s30, 3  ;;  %s229_s8 = scalar_lea.sflag (!%p968_p8), [#allocation4], %s1036_s30 }
  0x44   : > { %s232_s9 = scalar_lea.vmem (!%p968_p8), [#allocation3], %s581_s5  ;;  %p1131_p12 = scmp.ne.s32.totalorder (!%p968_p8), %s1125_s25, 0 }
  0x47   : > { %846 = dma.done.wait (%p1131_p12), %s229_s8, 128  }
  0x48   : > { %848 = vsyncadd (%p1131_p12), %s229_s8, 4294967168  ;;  %p1132_p3 = scmp.ne.s32.totalorder %s1123_s23, 0 }
  0x4a   : > { %850 = dma.done.wait (%p1132_p3), [#allocation7], 512  }
  0x4b   : > { %852 = vsyncadd (%p1132_p3), [#allocation7], 4294966784  ;;  %v886_v0 = vmov 0.0   ;;  %vm887_vm0 = vmmov 0   ;;  %v711_v1 = vld [vmem:[#allocation6 + $0x8] sm:$0xff]   ;;  %v712_v2 = vld [vmem:[#allocation8 + $0x8] sm:$0xff]  }
  0x4c   : > { %604 = vmatprep.subr.bf16.mxu0 %v886_v0  ;;  %611 = vmatprep.subr.bf16.mxu1 %v886_v0  ;;  %v713_v3 = vld [vmem:[#allocation6] sm:$0xff]   ;;  %v714_v4 = vld [vmem:[#allocation8] sm:$0xff]   ;;  %vm295_vm1 = vcmask 261120   ;;  %vm397_vm2 = vcmask 130048   ;;  %s593_s27 = sshll.u32 %s871_s18, 7  ;;  %s268_s10 = scalar_lea.vmem [#allocation9], %s581_s5 }
  0x4d   : > { %608 = vmatprep.mubr.msk.f32.mxu0 %vm887_vm0, %v886_v0  ;;  %615 = vmatprep.mubr.msk.f32.mxu1 %vm887_vm0, %v886_v0  ;;  %v278_v5 = vld [vmem:[%s232_s9] sm:$0xff]  ;;  %v396_v13 = vld [vmem:[%s1118_s3] sm:$0xf]  ;;  %s458_s11 = sshll.u32 %s268_s10, 4  ;;  %s1066_s13 = scalar_lea.hbm %s1119_s4, %s593_s27  ;;  %s1068_s11 = int_to_ptr.vmem [resolvable:$true] %s458_s11 }
  0x4e   : > { %605 = vmatpush3.bf16.msra.mxu0 %v711_v1  ;;  %612 = vmatpush3.bf16.msra.mxu1 %v712_v2  ;;  %s444_s14 = scalar_lea.sflag [#allocation5], %s1036_s30  ;;  %s795_s22 = scalar_lea.vmem %s1068_s11, 128 }
  0x4f   : > { %606 = vmatprep.subr.bf16.mxu0 %v886_v0  ;;  %613 = vmatprep.subr.bf16.mxu1 %v886_v0  ;;  %p796_p8 = scmp.ne.s32.totalorder %s1068_s11, %s795_s22  ;;  %s888_s18 = smov [#allocation9]  }
  0x50   : > { %s799_s29 = sshll.u32 %s888_s18, 4  ;;  %s800_s29 = int_to_ptr.vmem [resolvable:$false] %s799_s29 }
  0x51   : > { %p797_p9 = pnand %p796_p8, %p1009_p7  ;;  %s801_s6 = scalar_lea.vmem %s800_s29, 256 }
  0x52   : > { %607 = vmatpush3.bf16.msra.mxu0 %v713_v3  ;;  %614 = vmatpush3.bf16.msra.mxu1 %v714_v4  ;;  %p802_p2 = scmp.lt.s32.totalorder %s1068_s11, %s800_s29  ;;  %p803_p13 = scmp.lt.s32.totalorder %s801_s6, %s795_s22 }
  0x53   : > { %618 = vmatprep.subr.bf16.mxu0 %v886_v0  ;;  %p798_p11 = pneg %p797_p9 }
  0x54   : > { %p804_p0 = por %p803_p13, %p802_p2 }
  0x55   : > { %609 = vmatmul.mubr.msk.f32.vlgmr.msra.gmra.mxu0 %vm295_vm1, %v278_v5  ;;  %616 = vmatmul.mubr.msk.f32.vlgmr.msra.gmra.mxu1 %vm295_vm1, %v278_v5 }
  0x56   : > { %620 = vmatprep.mubr.msk.bf16.mxu0 %vm887_vm0, %v886_v0  ;;  %p805_p5 = pnand %p804_p0, %p798_p11 }
 0x115   : > { %v333_v6 = vpop.f32.mrf.mxu0  ;;  %v388_v7 = vpop.f32.mrf.mxu1 }
 0x116   : > { %337 = vst.msk [vmem:[#allocation2] sm:$0xff] %vm295_vm1, %v333_v6  ;;  %392 = vst.msk [vmem:[#allocation2 + $0x8] sm:$0xff] %vm295_vm1, %v388_v7 }
 0x117   : > { %v610_v8 = vpop.f32.mrf.mxu0  ;;  %v617_v9 = vpop.f32.mrf.mxu1 }
 0x11d   : > { %v393_v10 = vld [vmem:[#allocation2] sm:$0xff]  ;;  %v394_v11 = vld [vmem:[#allocation2 + $0x8] sm:$0xff] }
 0x11e   : > { %v395_v12 = vpack.c.bf16 %v394_v11, %v393_v10 }
 0x120   : > { %619 = vmatpush3.bf16.msra.mxu0 %v395_v12 }
 0x123   : > { %621 = vmatmul.mubr.msk.bf16.vlgmr.msra.gmra.mxu0 %vm397_vm2, %v396_v13 }
 0x1e3   : > { %v435_v14 = vpop.f32.mrf.mxu0 }
 0x1e4   : > { %442 = vst.msk [vmem:[%s268_s10] sm:$0xff] %vm295_vm1, %v435_v14 }
 0x1e5   : > { %v622_v15 = vpop.f32.mrf.mxu0 }
 0x1e6   : > { %808 = shalt.err (!%p805_p5)
}
 0x1e7   : > { %s809_s5 = scalar_lea.hbm %s1066_s13, 128  ;;  %s813_s9 = scalar_lea.hbm %s1119_s4, 256 }
 0x1e8   : > { %p810_p10 = scmp.ne.s32.totalorder %s1066_s13, %s809_s5  ;;  %p814_p6 = scmp.lt.s32.totalorder %s1066_s13, %s1119_s4 }
 0x1e9   : > { %p815_p12 = scmp.lt.s32.totalorder %s813_s9, %s809_s5 }
 0x1ea   : > { %p811_p1 = pnand %p810_p10, %p1009_p7 }
 0x1eb   : > { %p816_p3 = por %p815_p12, %p814_p6 }
 0x1ec   : > { %p812_p4 = pneg %p811_p1 }
 0x1ee   : > { %p817_p8 = pnand %p816_p3, %p812_p4 }
 0x1f0   : > { %820 = shalt.err (!%p817_p8)
}
 0x1f1   : > { %634 = dma.vmem_to_hbm [thread:$0]  (%p1009_p7), %s1068_s11, 128, %s1066_s13, %s444_s14   ;;  %v438_v16 = vpop.f32.mrf.mxu0 }
 0x1f3   : > { %v623_v17 = vpop.f32.mrf.mxu0 }
 0x1f4 PF: > { %s470_s27 = sand.u32 1, %s859_s15   ;;  %p1133_p9 = scmp.ne.s32.totalorder %s1126_s26, 0 }
 0x1f5   : > { %p1134_p11 = scmp.ge.s32.totalorder %s879_s20, 2  ;;  %s471_s10 = scalar_lea.sflag [#allocation5], %s470_s27 }
 0x1f7   : > { %p648_p2 = pnand %p1134_p11, %p1133_p9 }
 0x1f9   : > { %p649_p13 = pneg %p648_p2 }
 0x1fb   : > { %854 = dma.done.wait (%p649_p13), %s471_s10, 128  }
 0x1fc   : > { %856 = vsyncadd (%p649_p13), %s471_s10, 4294967168  ;;  %s21_s20 = sadd.s32 1, %s879_s20   ;;  %s1135_s15 = smov %s863_s16 }
 0x1fd   : > { %p18_p0 = scmp.ge.s32.totalorder %s21_s20, 4   ;;  %s1136_s16 = smov %s867_s17 }
 0x1fe   : > { %s1137_s17 = smov %s1018_s7  ;;  %s1138_s18 = smov %s875_s19 }
 0x1ff   : > { %s1139_s19 = smov %s1141_s21  ;;  %20 = sbr.rel (!%p18_p0) target bundleno = 7 (0x7), region = 96 }
 0x204   :  { %476 = vsyncpa [#allocation4], 1 }
 0x205   :  { %478 = vsyncpa [#allocation4 + $0x1], 1 }
 0x206   :  { %479 = vsyncpa [#allocation7], 1 }
 0x207   :  { %480 = vsyncpa [#allocation5], 1 }
 0x208   :  { %482 = vsyncpa [#allocation5 + $0x1], 1 }

</bundles_post_ra>
